<compile_context>
chip_gen: v5e
topology: v5e:2x2
jax: 0.10.0
libtpu: 0.0.40
codegen_flags: <defaults>
</compile_context>

<pallas_src>
import functools

import jax
import jax.numpy as jnp
from jax import lax
from jax.experimental import pallas as pl
from jax.experimental.pallas import tpu as pltpu

LANES = 128
ACC_ROWS = 32           # 4 sublane-groups of 8 -> 4 independent accumulation chains
MAX_TILE_ROWS = 8192    # 8192 x 128 x 4B = 4 MiB per f32 block (8 MiB double-buffered)
NUM_SPLITS = 2          # leading parallel axis; uses both TensorCores on v7x


def _variance_partials_kernel(x_ref, sum_ref, sq_ref, *, tile_rows, acc_rows,
                              blocks_per_split, total_rows, needs_mask):
    c = pl.program_id(0)            # core-parallel split
    i = pl.program_id(1)            # reduction step within the split
    n_slices = tile_rows // acc_rows

    # Fresh accumulators for this split's stream.
    @pl.when(i == 0)
    def _():
        sum_ref[...] = jnp.zeros_like(sum_ref)
        sq_ref[...] = jnp.zeros_like(sq_ref)

    gb = c * blocks_per_split + i   # global block index (pre-clamp)

    def slice_add(j, carry, masked):
        s, q = carry
        off = pl.multiple_of(j * acc_rows, acc_rows)
        xb = x_ref[pl.ds(off, acc_rows), :].astype(jnp.float32)
        if masked:
            rid = lax.broadcasted_iota(jnp.int32, (acc_rows, LANES), 0)
            valid = (gb * tile_rows + off + rid) < total_rows
            xb = jnp.where(valid, xb, jnp.float32(0.0))  # mask BEFORE squaring
        return s + xb, q + xb * xb

    def accumulate(masked):
        carry = (sum_ref[...], sq_ref[...])
        if n_slices == 1:
            s, q = slice_add(0, carry, masked)
        else:
            s, q = lax.fori_loop(
                0, n_slices,
                lambda j, cj: slice_add(j, cj, masked),
                carry, unroll=min(8, n_slices))
        sum_ref[...] = s
        sq_ref[...] = q

    if needs_mask:
        # Only block(s) reaching past the true row count take the masked path;
        # everything else stays on the unmasked fast path.
        is_tail = (gb + 1) * tile_rows > total_rows

        @pl.when(jnp.logical_not(is_tail))
        def _():
            accumulate(False)

        @pl.when(is_tail)
        def _():
            accumulate(True)
    else:
        accumulate(False)


def variance_times_weight(x: jax.Array, weight: float) -> jax.Array:
    """Pallas equivalent of `Variance(weight)(x)` -> scalar f32."""
    n = int(x.size)
    flat = x.reshape(-1)            # native dtype; cast happens in-kernel

    # Tiny lane pad only when the element count is not a multiple of 128;
    # the padded zeros do not affect either sum (the true n is used below).
    lane_pad = (-n) % LANES
    if lane_pad:
        flat = jnp.pad(flat, (0, lane_pad))

    rows = flat.shape[0] // LANES
    x2d = flat.reshape(rows, LANES)

    if rows >= ACC_ROWS:
        acc_rows = ACC_ROWS
        tile_rows = min(MAX_TILE_ROWS, (rows // ACC_ROWS) * ACC_ROWS)
    else:                           # tiny input: one block equal to the array
        acc_rows = rows
        tile_rows = rows

    num_blocks = pl.cdiv(rows, tile_rows)
    num_splits = NUM_SPLITS if num_blocks >= NUM_SPLITS else 1
    bps = pl.cdiv(num_blocks, num_splits)
    # Mask is needed if the grid over-covers the true row count (ragged last
    # block and/or one duplicate clamped block when num_blocks is odd).
    needs_mask = (num_splits * bps * tile_rows) != rows

    kernel = functools.partial(
        _variance_partials_kernel,
        tile_rows=tile_rows, acc_rows=acc_rows, blocks_per_split=bps,
        total_rows=rows, needs_mask=needs_mask)

    sum_p, sq_p = pl.pallas_call(
        kernel,
        out_shape=(
            jax.ShapeDtypeStruct((num_splits, acc_rows, LANES), jnp.float32),
            jax.ShapeDtypeStruct((num_splits, acc_rows, LANES), jnp.float32),
        ),
        grid=(num_splits, bps),
        in_specs=[
            # Clamp so the (at most one) over-covering block re-reads the last
            # valid block instead of issuing an OOB DMA; it is fully masked out
            # in-kernel.
            pl.BlockSpec((tile_rows, LANES),
                         lambda c, i: (jnp.minimum(c * bps + i, num_blocks - 1), 0)),
        ],
        out_specs=(
            pl.BlockSpec((None, acc_rows, LANES), lambda c, i: (c, 0, 0)),
            pl.BlockSpec((None, acc_rows, LANES), lambda c, i: (c, 0, 0)),
        ),
        compiler_params=pltpu.CompilerParams(
            dimension_semantics=("parallel", "arbitrary"),
        ),
    )(x2d)

    # Tiny final combine in the wrapper (scalar work, negligible).
    n_f = jnp.float32(n)
    s = jnp.sum(sum_p)
    ss = jnp.sum(sq_p)
    var = (ss - s * s / n_f) / (n_f - jnp.float32(1.0))
    return var * jnp.float32(weight)


if __name__ == "__main__":
    key = jax.random.PRNGKey(0)
    # Small NCHW input, consistent with the module's typical use on feature maps.
    x = jax.random.normal(key, (2, 4, 16, 16), dtype=jnp.float32)
    weight = 0.5  # deterministic "parameter" for the synthetic module

    out = variance_times_weight(x, weight)
    out = jax.block_until_ready(out)

    # Reference check: unbiased variance (ddof=1) over all elements * weight.
    ref = jnp.var(x, ddof=1) * weight
    assert jnp.allclose(out, ref, rtol=1e-5, atol=1e-6), (out, ref)

    print("KERNEL_OK")
</pallas_src>

<mosaic_0001>
module attributes {stable_mosaic.version = 11 : i64} {
  func.func @_variance_partials_kernel(%arg0: i32, %arg1: i32, %arg2: memref<16x128xf32, #tpu.memory_space<vmem>>, %arg3: memref<1x16x128xf32, #tpu.memory_space<vmem>>, %arg4: memref<1x16x128xf32, #tpu.memory_space<vmem>>) attributes {dimension_semantics = [#tpu.dimension_semantics<parallel>, #tpu.dimension_semantics<arbitrary>], iteration_bounds = array<i64: 1, 1>, scalar_prefetch = 0 : i64, scratch_operands = 0 : i64, tpu.core_type = #tpu.core_type<tc>, window_params = [{transform_indices = @transform_0, window_bounds = array<i64: 16, 128>}, {transform_indices = @transform_1, window_bounds = array<i64: 1, 16, 128>}, {transform_indices = @transform_2, window_bounds = array<i64: 1, 16, 128>}]} {
    %c0_i32 = arith.constant 0 : i32
    %0 = arith.cmpi eq, %arg1, %c0_i32 : i32
    %1 = arith.extui %0 : i1 to i32
    %c0_i32_0 = arith.constant 0 : i32
    %2 = arith.cmpi ne, %1, %c0_i32_0 : i32
    scf.if %2 {
      %cst = arith.constant 0.000000e+00 : f32
      %19 = vector.broadcast %cst : f32 to vector<16x128xf32>
      %c0_14 = arith.constant 0 : index
      %c0_15 = arith.constant 0 : index
      %c0_16 = arith.constant 0 : index
      %20 = vector.load %arg3[%c0_14, %c0_15, %c0_16] : memref<1x16x128xf32, #tpu.memory_space<vmem>>, vector<1x16x128xf32>
      %21 = vector.shape_cast %20 : vector<1x16x128xf32> to vector<16x128xf32>
      %22 = vector.shape_cast %19 : vector<16x128xf32> to vector<1x16x128xf32>
      tpu.vector_store %arg3[%c0_14, %c0_15, %c0_16], %22 {strides = array<i32>} : memref<1x16x128xf32, #tpu.memory_space<vmem>>, vector<1x16x128xf32>,
      %cst_17 = arith.constant 0.000000e+00 : f32
      %23 = vector.broadcast %cst_17 : f32 to vector<16x128xf32>
      %c0_18 = arith.constant 0 : index
      %c0_19 = arith.constant 0 : index
      %c0_20 = arith.constant 0 : index
      %24 = vector.load %arg4[%c0_18, %c0_19, %c0_20] : memref<1x16x128xf32, #tpu.memory_space<vmem>>, vector<1x16x128xf32>
      %25 = vector.shape_cast %24 : vector<1x16x128xf32> to vector<16x128xf32>
      %26 = vector.shape_cast %23 : vector<16x128xf32> to vector<1x16x128xf32>
      tpu.vector_store %arg4[%c0_18, %c0_19, %c0_20], %26 {strides = array<i32>} : memref<1x16x128xf32, #tpu.memory_space<vmem>>, vector<1x16x128xf32>,
    } else {
    }
    %c0 = arith.constant 0 : index
    %c0_1 = arith.constant 0 : index
    %c0_2 = arith.constant 0 : index
    %3 = vector.load %arg3[%c0, %c0_1, %c0_2] : memref<1x16x128xf32, #tpu.memory_space<vmem>>, vector<1x16x128xf32>
    %4 = vector.shape_cast %3 : vector<1x16x128xf32> to vector<16x128xf32>
    %c0_3 = arith.constant 0 : index
    %c0_4 = arith.constant 0 : index
    %c0_5 = arith.constant 0 : index
    %5 = vector.load %arg4[%c0_3, %c0_4, %c0_5] : memref<1x16x128xf32, #tpu.memory_space<vmem>>, vector<1x16x128xf32>
    %6 = vector.shape_cast %5 : vector<1x16x128xf32> to vector<16x128xf32>
    %c0_i32_6 = arith.constant 0 : i32
    %7 = tpu.assume_multiple %c0_i32_6, 16 : i32
    %8 = arith.index_cast %7 : i32 to index
    %c0_7 = arith.constant 0 : index
    %9 = vector.load %arg2[%8, %c0_7] : memref<16x128xf32, #tpu.memory_space<vmem>>, vector<16x128xf32>
    %10 = arith.addf %4, %9 : vector<16x128xf32>
    %11 = arith.mulf %9, %9 : vector<16x128xf32>
    %12 = arith.addf %6, %11 : vector<16x128xf32>
    %c0_8 = arith.constant 0 : index
    %c0_9 = arith.constant 0 : index
    %c0_10 = arith.constant 0 : index
    %13 = vector.load %arg3[%c0_8, %c0_9, %c0_10] : memref<1x16x128xf32, #tpu.memory_space<vmem>>, vector<1x16x128xf32>
    %14 = vector.shape_cast %13 : vector<1x16x128xf32> to vector<16x128xf32>
    %15 = vector.shape_cast %10 : vector<16x128xf32> to vector<1x16x128xf32>
    tpu.vector_store %arg3[%c0_8, %c0_9, %c0_10], %15 {strides = array<i32>} : memref<1x16x128xf32, #tpu.memory_space<vmem>>, vector<1x16x128xf32>,
    %c0_11 = arith.constant 0 : index
    %c0_12 = arith.constant 0 : index
    %c0_13 = arith.constant 0 : index
    %16 = vector.load %arg4[%c0_11, %c0_12, %c0_13] : memref<1x16x128xf32, #tpu.memory_space<vmem>>, vector<1x16x128xf32>
    %17 = vector.shape_cast %16 : vector<1x16x128xf32> to vector<16x128xf32>
    %18 = vector.shape_cast %12 : vector<16x128xf32> to vector<1x16x128xf32>
    tpu.vector_store %arg4[%c0_11, %c0_12, %c0_13], %18 {strides = array<i32>} : memref<1x16x128xf32, #tpu.memory_space<vmem>>, vector<1x16x128xf32>,
    return
  }
  func.func @transform_0(%arg0: i32, %arg1: i32) -> (i32, i32) {
    %c1_i32 = arith.constant 1 : i32
    %0 = arith.muli %arg0, %c1_i32 : i32
    %1 = arith.addi %0, %arg1 : i32
    %c0_i32 = arith.constant 0 : i32
    %2 = arith.minsi %1, %c0_i32 : i32
    %c0_i32_0 = arith.constant 0 : i32
    %c0_i32_1 = arith.constant 0 : i32
    return %2, %c0_i32_0 : i32, i32
  }
  func.func @transform_1(%arg0: i32, %arg1: i32) -> (i32, i32, i32) {
    %c0_i32 = arith.constant 0 : i32
    %c0_i32_0 = arith.constant 0 : i32
    %c0_i32_1 = arith.constant 0 : i32
    return %arg0, %c0_i32, %c0_i32_0 : i32, i32, i32
  }
  func.func @transform_2(%arg0: i32, %arg1: i32) -> (i32, i32, i32) {
    %c0_i32 = arith.constant 0 : i32
    %c0_i32_0 = arith.constant 0 : i32
    %c0_i32_1 = arith.constant 0 : i32
    return %arg0, %c0_i32, %c0_i32_0 : i32, i32, i32
  }
}

</mosaic_0001>

<bundles_post_ra>
// kernel: tpu_custom_call.1
= control target key start
LH: loop header
LB: loop body
LE: loop exit
PB: predicated region body
PF: predicated region fallthrough
CT: control target
= control target key end

     0   :  { %8 = vsyncpa [#allocation3], 0  ;;  %s214_s0 = inlined_call_operand.hbm [shape: f32[16,128], index: 0, kind: input, shape index: {}]   ;;  %s215_s1 = inlined_call_operand.hbm [shape: f32[1,16,128], index: 1, kind: output, shape index: {0}]   ;;  %s216_s2 = inlined_call_operand.hbm [shape: f32[1,16,128], index: 2, kind: output, shape index: {1}]  }
   0x1   :  { %9 = vsyncpa [#allocation4], 0 }
   0x2   :  { %10 = vsyncpa [#allocation7], 0  ;;  %s21_s11 = sshll.u32 %s214_s0, 4  ;;  %s185_s12 = smov [#allocation2]   ;;  %s22_s11 = int_to_ptr.hbm [resolvable:$true] %s21_s11 }
   0x3   :  { %s23_s13 = sshll.u32 %s185_s12, 4  ;;  %s186_s14 = smov 128   ;;  %s24_s13 = int_to_ptr.vmem [resolvable:$true] %s23_s13 }
   0x4   :  { %s187_s15 = smov 8  }
   0x5   :  { %29 = dma.hbm_to_vmem [thread:$0]  %s22_s11, 256, %s24_s13, [#allocation3], %s186_s14, %s186_s14, %s187_s15  }
   0x6   :  { %179 = dma.done.wait [#allocation3], 256  }
   0x7   :  { %180 = vsyncadd [#allocation3], 4294967040  ;;  %s188_s16 = smov [#allocation5]   ;;  %s68_s20 = sshll.u32 %s215_s1, 4  ;;  %v50_v0 = vld [vmem:[#allocation2] sm:$0xff]  ;;  %v51_v1 = vld [vmem:[#allocation2 + $0x8] sm:$0xff]  ;;  %s69_s20 = int_to_ptr.hbm [resolvable:$true] %s68_s20 }
   0x8   :  { %s66_s17 = sshll.u32 %s188_s16, 4  ;;  %v54_v2 = vmul.f32 %v50_v0, %v50_v0  ;;  %v55_v3 = vmul.f32 %v51_v1, %v51_v1  ;;  %s189_s0 = smov [#allocation6]   ;;  %58 = vst [vmem:[#allocation5] sm:$0xff] %v50_v0  ;;  %s67_s17 = int_to_ptr.vmem [resolvable:$true] %s66_s17 }
   0x9   :  { %s79_s21 = sshll.u32 %s189_s0, 4  ;;  %s81_s24 = sshll.u32 %s216_s2, 4  ;;  %59 = vst [vmem:[#allocation5 + $0x8] sm:$0xff] %v51_v1  ;;  %s80_s21 = int_to_ptr.vmem [resolvable:$true] %s79_s21  ;;  %s82_s24 = int_to_ptr.hbm [resolvable:$true] %s81_s24 }
   0xa   :  { %60 = vst [vmem:[#allocation6] sm:$0xff] %v54_v2  ;;  %74 = dma.vmem_to_hbm [thread:$0]  %s67_s17, 256, %s69_s20, [#allocation4], %s186_s14, %s186_s14, %s187_s15  }
   0xb   :  { %61 = vst [vmem:[#allocation6 + $0x8] sm:$0xff] %v55_v3 }
   0xc   :  { %87 = dma.vmem_to_hbm [thread:$0]  %s80_s21, 256, %s82_s24, [#allocation7], %s186_s14, %s186_s14, %s187_s15  }
   0xd   :  { %181 = dma.done.wait [#allocation4], 256  }
   0xe   :  { %182 = vsyncadd [#allocation4], 4294967040 }
   0xf   :  { %183 = dma.done.wait [#allocation7], 256  }
  0x10   :  { %184 = vsyncadd [#allocation7], 4294967040 }
  0x11   :  { %96 = vsyncpa [#allocation3], 1 }
  0x12   :  { %97 = vsyncpa [#allocation4], 1 }
  0x13   :  { %98 = vsyncpa [#allocation7], 1 }

</bundles_post_ra>
